<compile_context>
chip_gen: v6e
topology: v6e:2x2x1
jax: 0.10.0
libtpu: 0.0.40
codegen_flags: <defaults>
</compile_context>

<pallas_src>
import functools

import jax
import jax.numpy as jnp
from jax.experimental import pallas as pl
from jax.experimental.pallas import tpu as pltpu

LANE = 128
SUBLANE = 8


def _round_up(x, m):
    return ((x + m - 1) // m) * m


def _cdiv(a, b):
    return -(-a // b)


# ----------------------------- Pallas kernel --------------------------------

def _agmodel_mlp_kernel(xt_ref, w1t_ref, b1_ref, w2t_ref, b2_ref, w3t_ref,
                        b3_ref, ot_ref, *, max_action):
    # Transposed layout: the batch lives on the lane axis throughout.
    #   xt : (D1p, TB)          w1t: (256, D1p)   b1: (256, 1)  f32
    #                           w2t: (64, 256)    b2: (64, 1)   f32
    #                           w3t: (D2p, 64)    b3: (D2p, 1)  f32
    #   ot : (D2p, TB)  f32     (D2p = D2 rounded to 16 sublanes)
    # Weights may be bf16; activations are kept/cast in the weight dtype for
    # the MXU and accumulated in f32 (preferred_element_type).
    wdt = w1t_ref.dtype
    xt = xt_ref[...]                                   # already compute dtype

    h1 = jnp.dot(w1t_ref[...], xt,
                 preferred_element_type=jnp.float32) + b1_ref[...]
    h1 = jnp.maximum(h1, 0.0)                          # ReLU, (256, TB) f32

    h2 = jnp.dot(w2t_ref[...], h1.astype(wdt),
                 preferred_element_type=jnp.float32) + b2_ref[...]
    h2 = jnp.maximum(h2, 0.0)                          # ReLU, (64, TB) f32

    h3 = jnp.dot(w3t_ref[...], h2.astype(wdt),
                 preferred_element_type=jnp.float32) + b3_ref[...]
    ot_ref[...] = (jnp.tanh(h3) * max_action).astype(ot_ref.dtype)


# ------------------------------- tiling --------------------------------------

def _choose_tiling(B, batch_tile):
    """Balanced batch tiles.

    * tile is a multiple of 128 so the transposed output block is lane-dense
      (unmasked vst) and the input block is lane-dense too.
    * #tiles minimizes padded rows instead of rounding Bp up to tile.
    * whenever the batch is big enough, guarantee >=2 grid steps so
      dimension_semantics=("parallel",) actually shards across v7x's 2 TCs.
    """
    n0 = max(1, _cdiv(B, batch_tile))
    if n0 == 1 and B >= 2 * LANE:
        n0 = 2
    best = None
    for n in range(n0, n0 + 5):            # tiny search for least padding
        tile = _round_up(_cdiv(B, n), LANE)
        Bp = n * tile
        if best is None or Bp < best[1]:
            best = (tile, Bp, n)
    return best


# ------------------------------ fc wrapper ------------------------------------

def agmodel_forward_fc(action, params, *, max_action=1.0, batch_tile=4096,
                       compute_dtype=jnp.float32, min_kernel_batch=512):
    """Runs the fc path of AGmodel: Tanh(MLP(action)) * max_action.

    compute_dtype=jnp.bfloat16 is fine on any generation's MXU (accumulation,
    bias add and tanh stay f32); keep f32 when bit-accuracy vs. an f32
    reference matters.  Batches below `min_kernel_batch` run as a plain XLA
    dot chain (the Pallas call would be pure launch/pipeline overhead there).
    """
    w1, b1, w2, b2, w3, b3 = params
    B, D1 = action.shape
    D2 = w3.shape[1]

    if B < min_kernel_batch:
        # Small-batch bypass: same math, same f32 numerics, no kernel.
        h = jnp.maximum(action @ w1 + b1, 0.0)
        h = jnp.maximum(h @ w2 + b2, 0.0)
        return jnp.tanh(h @ w3 + b3) * max_action

    D1p = _round_up(D1, SUBLANE)            # pad tiny contraction dim
    D2p = _round_up(D2, SUBLANE)            # 9 -> 16 sublanes (not 128 lanes!)

    tile, Bp, n_tiles = _choose_tiling(B, batch_tile)

    # Transposed, pre-cast weights (batch on the lane axis inside the kernel).
    w1t = jnp.pad(w1.T.astype(compute_dtype), ((0, 0), (0, D1p - D1)))
    w2t = w2.T.astype(compute_dtype)
    w3t = jnp.pad(w3.T.astype(compute_dtype), ((0, D2p - D2), (0, 0)))
    b1c = b1.astype(jnp.float32).reshape(-1, 1)
    b2c = b2.astype(jnp.float32).reshape(-1, 1)
    b3c = jnp.pad(b3.astype(jnp.float32), (0, D2p - D2)).reshape(-1, 1)

    # x^T, zero-padded to (D1p, Bp), cast ONCE here (not per grid step).
    xt = jnp.pad(action.T.astype(compute_dtype),
                 ((0, D1p - D1), (0, Bp - B)))

    kernel = functools.partial(_agmodel_mlp_kernel, max_action=max_action)

    weight_bytes = sum(int(a.size) * a.dtype.itemsize
                       for a in (w1t, w2t, w3t, b1c, b2c, b3c))
    cost = pl.CostEstimate(
        flops=2 * B * (D1 * 256 + 256 * 64 + 64 * D2),
        transcendentals=B * D2,
        bytes_accessed=int(xt.size) * xt.dtype.itemsize
        + Bp * D2p * 4 + weight_bytes)

    out_t = pl.pallas_call(
        kernel,
        out_shape=jax.ShapeDtypeStruct((D2p, Bp), jnp.float32),
        grid_spec=pltpu.PrefetchScalarGridSpec(
            num_scalar_prefetch=0,
            grid=(n_tiles,),
            in_specs=[
                pl.BlockSpec((D1p, tile), lambda i: (0, i)),   # x^T tile
                pl.BlockSpec(w1t.shape, lambda i: (0, 0)),     # W1^T (resident)
                pl.BlockSpec(b1c.shape, lambda i: (0, 0)),     # b1
                pl.BlockSpec(w2t.shape, lambda i: (0, 0)),     # W2^T
                pl.BlockSpec(b2c.shape, lambda i: (0, 0)),     # b2
                pl.BlockSpec(w3t.shape, lambda i: (0, 0)),     # W3^T (16 rows)
                pl.BlockSpec(b3c.shape, lambda i: (0, 0)),     # b3
            ],
            out_specs=pl.BlockSpec((D2p, tile), lambda i: (0, i)),  # lane-dense
        ),
        compiler_params=pltpu.CompilerParams(
            dimension_semantics=("parallel",),          # batch across TCs
            vmem_limit_bytes=32 * 1024 * 1024),         # safe on v5e/v6e/v7x
        cost_estimate=cost,
    )(xt, w1t, b1c, w2t, b2c, w3t, b3c)

    # Tiny (D2, B) transpose back to row-major batch layout.
    return out_t[:D2, :B].T


# ------------------------- init_start (glue) path ----------------------------

def agmodel_get_init_action(action, env, direction):
    """Hand-crafted action cloning — pure slicing/concat, plain JAX."""
    if env == 'Swimmer-v2':
        if direction == '1to2':
            return jnp.concatenate((action, action[:, 0:1]), axis=1)
        return action[:, :2]
    if env == 'HalfCheetah-v2':
        if direction == '1to2':
            return jnp.concatenate(
                (action[:, :3], action[:, :3], action[:, 3:6]), axis=1)
        return jnp.concatenate((action[:, :3], action[:, 6:9]), axis=1)
    return action


def agmodel_forward(action, params, *, init_start, env, direction,
                    max_action=1.0, batch_tile=4096,
                    compute_dtype=jnp.float32, min_kernel_batch=512):
    if init_start:
        return agmodel_get_init_action(action, env, direction)
    return agmodel_forward_fc(action, params, max_action=max_action,
                              batch_tile=batch_tile,
                              compute_dtype=compute_dtype,
                              min_kernel_batch=min_kernel_batch)


# -------------------------- deterministic params -----------------------------

def make_params(key, action_dim1, action_dim2):
    """PyTorch-style Linear init: U(-1/sqrt(fan_in), 1/sqrt(fan_in))."""
    dims = [(action_dim1, 256), (256, 64), (64, action_dim2)]
    params = []
    for i, (fan_in, fan_out) in enumerate(dims):
        kw, kb = jax.random.split(jax.random.fold_in(key, i))
        bound = 1.0 / jnp.sqrt(jnp.float32(fan_in))
        w = jax.random.uniform(kw, (fan_in, fan_out), jnp.float32,
                               minval=-bound, maxval=bound)
        b = jax.random.uniform(kb, (fan_out,), jnp.float32,
                               minval=-bound, maxval=bound)
        params += [w, b]
    return tuple(params)


def reference_forward(action, params, max_action=1.0):
    w1, b1, w2, b2, w3, b3 = params
    h = jnp.maximum(action @ w1 + b1, 0.0)
    h = jnp.maximum(h @ w2 + b2, 0.0)
    return jnp.tanh(h @ w3 + b3) * max_action


# ---------------------------------- main -------------------------------------

if __name__ == "__main__":
    # HalfCheetah-like dims: dir='1to2' -> action_dim1=6, action_dim2=9.
    batch, action_dim1, action_dim2 = 2, 6, 9

    key = jax.random.PRNGKey(0)
    k_act, k_par = jax.random.split(key)
    action = jax.random.normal(k_act, (batch, action_dim1), jnp.float32)
    params = make_params(k_par, action_dim1, action_dim2)

    # Learned path, forcing the Pallas kernel even at this tiny batch
    # (min_kernel_batch=0); f32 compute so it matches the f32 reference.
    out = agmodel_forward(action, params, init_start=False,
                          env='HalfCheetah-v2', direction='1to2',
                          min_kernel_batch=0)
    out = jax.block_until_ready(out)

    ref = reference_forward(action, params)
    assert out.shape == (batch, action_dim2), out.shape
    assert jnp.allclose(out, ref, atol=1e-5, rtol=1e-5), "mismatch vs reference"

    # Multi-tile path: batch=64 with batch_tile=32 -> grid of 2 steps
    # (tiles rounded to 128 lanes for the transposed, lane-dense output).
    action2 = jax.random.normal(jax.random.fold_in(key, 7), (64, action_dim1),
                                jnp.float32)
    out2 = agmodel_forward(action2, params, init_start=False,
                           env='HalfCheetah-v2', direction='1to2',
                           batch_tile=32, min_kernel_batch=0)
    out2 = jax.block_until_ready(out2)
    ref2 = reference_forward(action2, params)
    assert out2.shape == (64, action_dim2)
    assert jnp.allclose(out2, ref2, atol=1e-5, rtol=1e-5), "mismatch (tiled)"

    # Small-batch bypass path (default min_kernel_batch): pure XLA dot chain.
    out3 = agmodel_forward(action2, params, init_start=False,
                           env='HalfCheetah-v2', direction='1to2')
    out3 = jax.block_until_ready(out3)
    assert jnp.allclose(out3, ref2, atol=1e-5, rtol=1e-5), "mismatch (bypass)"

    # init_start glue path (no kernel needed).
    init_out = agmodel_forward(action, params, init_start=True,
                               env='HalfCheetah-v2', direction='1to2')
    jax.block_until_ready(init_out)
    assert init_out.shape == (batch, 9)

    print("KERNEL_OK")
</pallas_src>

<mosaic_0001>
module attributes {stable_mosaic.version = 11 : i64} {
  func.func @_agmodel_mlp_kernel(%arg0: i32, %arg1: memref<8x128xf32, #tpu.memory_space<vmem>>, %arg2: memref<256x8xf32, #tpu.memory_space<vmem>>, %arg3: memref<256x1xf32, #tpu.memory_space<vmem>>, %arg4: memref<64x256xf32, #tpu.memory_space<vmem>>, %arg5: memref<64x1xf32, #tpu.memory_space<vmem>>, %arg6: memref<16x64xf32, #tpu.memory_space<vmem>>, %arg7: memref<16x1xf32, #tpu.memory_space<vmem>>, %arg8: memref<16x128xf32, #tpu.memory_space<vmem>>) attributes {dimension_semantics = [#tpu.dimension_semantics<parallel>], iteration_bounds = array<i64: 1>, scalar_prefetch = 0 : i64, scratch_operands = 0 : i64, tpu.core_type = #tpu.core_type<tc>, window_params = [{transform_indices = @transform_0, window_bounds = array<i64: 8, 128>}, {pipeline_mode = #tpu.pipeline_mode<synchronous>, transform_indices = @transform_1, window_bounds = array<i64: 256, 8>}, {pipeline_mode = #tpu.pipeline_mode<synchronous>, transform_indices = @transform_2, window_bounds = array<i64: 256, 1>}, {pipeline_mode = #tpu.pipeline_mode<synchronous>, transform_indices = @transform_3, window_bounds = array<i64: 64, 256>}, {pipeline_mode = #tpu.pipeline_mode<synchronous>, transform_indices = @transform_4, window_bounds = array<i64: 64, 1>}, {pipeline_mode = #tpu.pipeline_mode<synchronous>, transform_indices = @transform_5, window_bounds = array<i64: 16, 64>}, {pipeline_mode = #tpu.pipeline_mode<synchronous>, transform_indices = @transform_6, window_bounds = array<i64: 16, 1>}, {transform_indices = @transform_7, window_bounds = array<i64: 16, 128>}]} {
    %c0 = arith.constant 0 : index
    %c0_0 = arith.constant 0 : index
    %0 = vector.load %arg1[%c0, %c0_0] : memref<8x128xf32, #tpu.memory_space<vmem>>, vector<8x128xf32>
    %c0_1 = arith.constant 0 : index
    %c0_2 = arith.constant 0 : index
    %1 = vector.load %arg2[%c0_1, %c0_2] : memref<256x8xf32, #tpu.memory_space<vmem>>, vector<256x8xf32>
    %cst = arith.constant dense<0.000000e+00> : vector<256x128xf32>
    %2 = tpu.matmul %1, %0, %cst {dimension_numbers = #tpu.dot_dimension_numbers<[1], [0], [0], [1], [0, 0, 1, 1], [], []>} : vector<256x8xf32>, vector<8x128xf32>, vector<256x128xf32> -> vector<256x128xf32>
    %c0_3 = arith.constant 0 : index
    %c0_4 = arith.constant 0 : index
    %3 = vector.load %arg3[%c0_3, %c0_4] : memref<256x1xf32, #tpu.memory_space<vmem>>, vector<256x1xf32>
    %4 = vector.broadcast %3 : vector<256x1xf32> to vector<256x128xf32>
    %5 = arith.addf %2, %4 : vector<256x128xf32>
    %cst_5 = arith.constant 0.000000e+00 : f32
    %6 = vector.broadcast %cst_5 : f32 to vector<256x128xf32>
    %7 = arith.maximumf %5, %6 : vector<256x128xf32>
    %c0_6 = arith.constant 0 : index
    %c0_7 = arith.constant 0 : index
    %8 = vector.load %arg4[%c0_6, %c0_7] : memref<64x256xf32, #tpu.memory_space<vmem>>, vector<64x256xf32>
    %cst_8 = arith.constant dense<0.000000e+00> : vector<64x128xf32>
    %9 = tpu.matmul %8, %7, %cst_8 {dimension_numbers = #tpu.dot_dimension_numbers<[1], [0], [0], [1], [0, 0, 1, 1], [], []>} : vector<64x256xf32>, vector<256x128xf32>, vector<64x128xf32> -> vector<64x128xf32>
    %c0_9 = arith.constant 0 : index
    %c0_10 = arith.constant 0 : index
    %10 = vector.load %arg5[%c0_9, %c0_10] : memref<64x1xf32, #tpu.memory_space<vmem>>, vector<64x1xf32>
    %11 = vector.broadcast %10 : vector<64x1xf32> to vector<64x128xf32>
    %12 = arith.addf %9, %11 : vector<64x128xf32>
    %cst_11 = arith.constant 0.000000e+00 : f32
    %13 = vector.broadcast %cst_11 : f32 to vector<64x128xf32>
    %14 = arith.maximumf %12, %13 : vector<64x128xf32>
    %c0_12 = arith.constant 0 : index
    %c0_13 = arith.constant 0 : index
    %15 = vector.load %arg6[%c0_12, %c0_13] : memref<16x64xf32, #tpu.memory_space<vmem>>, vector<16x64xf32>
    %cst_14 = arith.constant dense<0.000000e+00> : vector<16x128xf32>
    %16 = tpu.matmul %15, %14, %cst_14 {dimension_numbers = #tpu.dot_dimension_numbers<[1], [0], [0], [1], [0, 0, 1, 1], [], []>} : vector<16x64xf32>, vector<64x128xf32>, vector<16x128xf32> -> vector<16x128xf32>
    %c0_15 = arith.constant 0 : index
    %c0_16 = arith.constant 0 : index
    %17 = vector.load %arg7[%c0_15, %c0_16] : memref<16x1xf32, #tpu.memory_space<vmem>>, vector<16x1xf32>
    %18 = vector.broadcast %17 : vector<16x1xf32> to vector<16x128xf32>
    %19 = arith.addf %16, %18 : vector<16x128xf32>
    %20 = math.tanh %19 : vector<16x128xf32>
    %cst_17 = arith.constant 1.000000e+00 : f32
    %21 = vector.broadcast %cst_17 : f32 to vector<16x128xf32>
    %22 = arith.mulf %20, %21 : vector<16x128xf32>
    %c0_18 = arith.constant 0 : index
    %c0_19 = arith.constant 0 : index
    %23 = vector.load %arg8[%c0_18, %c0_19] : memref<16x128xf32, #tpu.memory_space<vmem>>, vector<16x128xf32>
    tpu.vector_store %arg8[%c0_18, %c0_19], %22 {strides = array<i32>} : memref<16x128xf32, #tpu.memory_space<vmem>>, vector<16x128xf32>,
    return
  }
  func.func @transform_0(%arg0: i32) -> (i32, i32) {
    %c0_i32 = arith.constant 0 : i32
    %c0_i32_0 = arith.constant 0 : i32
    return %c0_i32, %arg0 : i32, i32
  }
  func.func @transform_1(%arg0: i32) -> (i32, i32) {
    %c0_i32 = arith.constant 0 : i32
    %c0_i32_0 = arith.constant 0 : i32
    %c0_i32_1 = arith.constant 0 : i32
    return %c0_i32, %c0_i32_0 : i32, i32
  }
  func.func @transform_2(%arg0: i32) -> (i32, i32) {
    %c0_i32 = arith.constant 0 : i32
    %c0_i32_0 = arith.constant 0 : i32
    %c0_i32_1 = arith.constant 0 : i32
    return %c0_i32, %c0_i32_0 : i32, i32
  }
  func.func @transform_3(%arg0: i32) -> (i32, i32) {
    %c0_i32 = arith.constant 0 : i32
    %c0_i32_0 = arith.constant 0 : i32
    %c0_i32_1 = arith.constant 0 : i32
    return %c0_i32, %c0_i32_0 : i32, i32
  }
  func.func @transform_4(%arg0: i32) -> (i32, i32) {
    %c0_i32 = arith.constant 0 : i32
    %c0_i32_0 = arith.constant 0 : i32
    %c0_i32_1 = arith.constant 0 : i32
    return %c0_i32, %c0_i32_0 : i32, i32
  }
  func.func @transform_5(%arg0: i32) -> (i32, i32) {
    %c0_i32 = arith.constant 0 : i32
    %c0_i32_0 = arith.constant 0 : i32
    %c0_i32_1 = arith.constant 0 : i32
    return %c0_i32, %c0_i32_0 : i32, i32
  }
  func.func @transform_6(%arg0: i32) -> (i32, i32) {
    %c0_i32 = arith.constant 0 : i32
    %c0_i32_0 = arith.constant 0 : i32
    %c0_i32_1 = arith.constant 0 : i32
    return %c0_i32, %c0_i32_0 : i32, i32
  }
  func.func @transform_7(%arg0: i32) -> (i32, i32) {
    %c0_i32 = arith.constant 0 : i32
    %c0_i32_0 = arith.constant 0 : i32
    return %c0_i32, %arg0 : i32, i32
  }
}

</mosaic_0001>

<bundles_post_ra>
// kernel: tpu_custom_call.1
= control target key start
LH: loop header
LB: loop body
LE: loop exit
PB: predicated region body
PF: predicated region fallthrough
CT: control target
= control target key end

     0   :  { %vm252_vm0 = vcmask 64512   ;;  %v1133_v4 = vmov 0   ;;  %s1553_s0 = inlined_call_operand.vmem [shape: f32[8,128], index: 0, kind: input, shape index: {}]   ;;  %s1554_s1 = inlined_call_operand.vmem [shape: f32[256,8], index: 1, kind: input, shape index: {}]   ;;  %s1555_s2 = inlined_call_operand.vmem [shape: f32[256,1], index: 2, kind: input, shape index: {}]   ;;  %s1556_s3 = inlined_call_operand.vmem [shape: f32[64,256], index: 3, kind: input, shape index: {}]   ;;  %s1557_s4 = inlined_call_operand.vmem [shape: f32[64,1], index: 4, kind: input, shape index: {}]   ;;  %s1558_s5 = inlined_call_operand.vmem [shape: f32[16,64], index: 5, kind: input, shape index: {}]   ;;  %s1559_s6 = inlined_call_operand.vmem [shape: f32[16,1], index: 6, kind: input, shape index: {}]   ;;  %s1560_s7 = inlined_call_operand.hbm [shape: f32[16,128], index: 7, kind: output, shape index: {}]  }
   0x1   :  { %v27_v0 = vld [vmem:[%s1553_s0] sm:$0xff]  ;;  %v29_v2 = vld [vmem:[%s1554_s1 + $0x8] sm:$0xff]  ;;  %v30_v3 = vld [vmem:[%s1554_s1 + $0x10] sm:$0xff]  ;;  %1106 = vset.pattern.permute.xlu1 %v1133_v4  ;;  %1105 = vset.pattern.permute.xlu0 %v1133_v4 }
   0x2   :  { %v28_v1 = vld [vmem:[%s1554_s1] sm:$0xff]  ;;  %1032 = vmatprep.subr.mxu0 %v27_v0  ;;  %v90_v5 = vld [vmem:[%s1555_s2 + $0xf0] sm:$0xff]  ;;  %v31_v6 = vld [vmem:[%s1554_s1 + $0x18] sm:$0xff] }
   0x3   :  { %1034 = vmatprep.mubr.msk.f32.mxu0 %vm252_vm0, %v28_v1  ;;  %1033 = vmatpush3.msra.mxu0 %v27_v0  ;;  %v74_v7 = vld [vmem:[%s1555_s2 + $0x70] sm:$0xff]  ;;  %v91_v8 = vld [vmem:[%s1555_s2 + $0xf8] sm:$0xff]  ;;  %v32_v9 = vld [vmem:[%s1554_s1 + $0x20] sm:$0xff] }
   0x4   :  { %1035 = vmatmul.mubr.msk.f32.vlgmr.msra.gmra.mxu0 %vm252_vm0, %v29_v2  ;;  %244 = vperm.xlu1 %1106, %v90_v5   ;;  %v75_v10 = vld [vmem:[%s1555_s2 + $0x78] sm:$0xff]  ;;  %v33_v11 = vld [vmem:[%s1554_s1 + $0x28] sm:$0xff]  ;;  %v34_v13 = vld [vmem:[%s1554_s1 + $0x30] sm:$0xff] }
   0x5   :  { %1037 = vmatprep.mubr.msk.f32.mxu0 %vm252_vm0, %v30_v3  ;;  %249 = vperm.xlu0 %1105, %v91_v8   ;;  %v73_v12 = vld [vmem:[%s1555_s2 + $0x68] sm:$0xff]  ;;  %v35_v15 = vld [vmem:[%s1554_s1 + $0x38] sm:$0xff]  ;;  %v72_v16 = vld [vmem:[%s1555_s2 + $0x60] sm:$0xff] }
   0x6   :  { %v89_v14 = vld [vmem:[%s1555_s2 + $0xe8] sm:$0xff]  ;;  %v36_v17 = vld [vmem:[%s1554_s1 + $0x40] sm:$0xff]  ;;  %v71_v20 = vld [vmem:[%s1555_s2 + $0x58] sm:$0xff] }
   0x7   :  { %v88_v18 = vld [vmem:[%s1555_s2 + $0xe0] sm:$0xff]  ;;  %v37_v19 = vld [vmem:[%s1554_s1 + $0x48] sm:$0xff]  ;;  %v38_v21 = vld [vmem:[%s1554_s1 + $0x50] sm:$0xff] }
   0x8   :  { %1038 = vmatmul.mubr.msk.f32.gmra.mxu0 %vm252_vm0, %v31_v6  ;;  %164 = vperm.xlu1 %1106, %v74_v7   ;;  %v87_v22 = vld [vmem:[%s1555_s2 + $0xd8] sm:$0xff]  ;;  %v70_v24 = vld [vmem:[%s1555_s2 + $0x50] sm:$0xff]  ;;  %v40_v25 = vld [vmem:[%s1554_s1 + $0x60] sm:$0xff] }
   0x9   :  { %1040 = vmatprep.mubr.msk.f32.mxu0 %vm252_vm0, %v32_v9  ;;  %169 = vperm.xlu0 %1105, %v75_v10   ;;  %v39_v23 = vld [vmem:[%s1554_s1 + $0x58] sm:$0xff]  ;;  %v86_v26 = vld [vmem:[%s1555_s2 + $0xd0] sm:$0xff]  ;;  %v41_v27 = vld [vmem:[%s1554_s1 + $0x68] sm:$0xff] }
   0xa   :  { %v69_v28 = vld [vmem:[%s1555_s2 + $0x48] sm:$0xff]  ;;  %v42_v29 = vld [vmem:[%s1554_s1 + $0x70] sm:$0xff] }
   0xc   :  { %1041 = vmatmul.mubr.msk.f32.gmra.mxu0 %vm252_vm0, %v33_v11  ;;  %159 = vperm.xlu1 %1106, %v73_v12  }
   0xd   :  { %1043 = vmatprep.mubr.msk.f32.mxu0 %vm252_vm0, %v34_v13  ;;  %239 = vperm.xlu0 %1105, %v89_v14  }
  0x10   :  { %1044 = vmatmul.mubr.msk.f32.gmra.mxu0 %vm252_vm0, %v35_v15  ;;  %154 = vperm.xlu1 %1106, %v72_v16  }
  0x11   :  { %1046 = vmatprep.mubr.msk.f32.mxu0 %vm252_vm0, %v36_v17  ;;  %234 = vperm.xlu0 %1105, %v88_v18  }
  0x14   :  { %1047 = vmatmul.mubr.msk.f32.gmra.mxu0 %vm252_vm0, %v37_v19  ;;  %149 = vperm.xlu1 %1106, %v71_v20  }
  0x15   :  { %1049 = vmatprep.mubr.msk.f32.mxu0 %vm252_vm0, %v38_v21  ;;  %229 = vperm.xlu0 %1105, %v87_v22  }
  0x18   :  { %1050 = vmatmul.mubr.msk.f32.gmra.mxu0 %vm252_vm0, %v39_v23  ;;  %144 = vperm.xlu1 %1106, %v70_v24  }
  0x19   :  { %1052 = vmatprep.mubr.msk.f32.mxu0 %vm252_vm0, %v40_v25  ;;  %224 = vperm.xlu0 %1105, %v86_v26  }
  0x1a   :  { %12 = vsyncpa [#allocation3], 0  ;;  %v85_v30 = vld [vmem:[%s1555_s2 + $0xc8] sm:$0xff]  ;;  %v43_v31 = vld [vmem:[%s1554_s1 + $0x78] sm:$0xff]  ;;  %vm797_vm1 = vcmask 523264   ;;  %s1134_s9 = smov [#allocation2]  }
  0x1b   :  { %v68_v32 = vld [vmem:[%s1555_s2 + $0x40] sm:$0xff]  ;;  %v45_v35 = vld [vmem:[%s1554_s1 + $0x88] sm:$0xff]  ;;  %v67_v36 = vld [vmem:[%s1555_s2 + $0x38] sm:$0xff]  ;;  %s888_s10 = sshll.u32 %s1134_s9, 4  ;;  %s889_s10 = int_to_ptr.vmem [resolvable:$true] %s888_s10 }
  0x1c   :  { %1053 = vmatmul.mubr.msk.f32.gmra.mxu0 %vm252_vm0, %v41_v27  ;;  %139 = vperm.xlu1 %1106, %v69_v28   ;;  %v44_v33 = vld [vmem:[%s1554_s1 + $0x80] sm:$0xff]  ;;  %v46_v37 = vld [vmem:[%s1554_s1 + $0x90] sm:$0xff]  ;;  %v83_v38 = vld [vmem:[%s1555_s2 + $0xb8] sm:$0xff]  ;;  %p1116_p1 = scmp.lt.s32.totalorder %s889_s10, %s889_s10 }
  0x1d   :  { %1055 = vmatprep.mubr.msk.f32.mxu0 %vm252_vm0, %v42_v29  ;;  %219 = vperm.xlu0 %1105, %v85_v30   ;;  %v84_v34 = vld [vmem:[%s1555_s2 + $0xc0] sm:$0xff]  ;;  %v47_v39 = vld [vmem:[%s1554_s1 + $0x98] sm:$0xff]  ;;  %v66_v40 = vld [vmem:[%s1555_s2 + $0x30] sm:$0xff] }
  0x1e   :  { %v48_v41 = vld [vmem:[%s1554_s1 + $0xa0] sm:$0xff]  ;;  %v82_v42 = vld [vmem:[%s1555_s2 + $0xb0] sm:$0xff]  ;;  %v49_v43 = vld [vmem:[%s1554_s1 + $0xa8] sm:$0xff] }
  0x1f   :  { %v65_v44 = vld [vmem:[%s1555_s2 + $0x28] sm:$0xff]  ;;  %v50_v45 = vld [vmem:[%s1554_s1 + $0xb0] sm:$0xff]  ;;  %v51_v47 = vld [vmem:[%s1554_s1 + $0xb8] sm:$0xff] }
  0x20   :  { %1056 = vmatmul.mubr.msk.f32.gmra.mxu0 %vm252_vm0, %v43_v31  ;;  %134 = vperm.xlu1 %1106, %v68_v32   ;;  %v81_v46 = vld [vmem:[%s1555_s2 + $0xa8] sm:$0xff]  ;;  %v64_v48 = vld [vmem:[%s1555_s2 + $0x20] sm:$0xff]  ;;  %v63_v52 = vld [vmem:[%s1555_s2 + $0x18] sm:$0xff] }
  0x21   :  { %1058 = vmatprep.mubr.msk.f32.mxu0 %vm252_vm0, %v44_v33  ;;  %214 = vperm.xlu0 %1105, %v84_v34   ;;  %v52_v49 = vld [vmem:[%s1554_s1 + $0xc0] sm:$0xff]  ;;  %v53_v51 = vld [vmem:[%s1554_s1 + $0xc8] sm:$0xff]  ;;  %v54_v53 = vld [vmem:[%s1554_s1 + $0xd0] sm:$0xff] }
  0x22   :  { %v80_v50 = vld [vmem:[%s1555_s2 + $0xa0] sm:$0xff]  ;;  %v79_v54 = vld [vmem:[%s1555_s2 + $0x98] sm:$0xff]  ;;  %v62_v56 = vld [vmem:[%s1555_s2 + $0x10] sm:$0xff] }
  0x23   :  { %v55_v55 = vld [vmem:[%s1554_s1 + $0xd8] sm:$0xff]  ;;  %v56_v57 = vld [vmem:[%s1554_s1 + $0xe0] sm:$0xff]  ;;  %v78_v58 = vld [vmem:[%s1555_s2 + $0x90] sm:$0xff] }
  0x24   :  { %1059 = vmatmul.mubr.msk.f32.gmra.mxu0 %vm252_vm0, %v45_v35  ;;  %129 = vperm.xlu1 %1106, %v67_v36   ;;  %v57_v59 = vld [vmem:[%s1554_s1 + $0xe8] sm:$0xff]  ;;  %v58_v61 = vld [vmem:[%s1554_s1 + $0xf0] sm:$0xff]  ;;  %v59_v63 = vld [vmem:[%s1554_s1 + $0xf8] sm:$0xff] }
  0x25   :  { %1061 = vmatprep.mubr.msk.f32.mxu0 %vm252_vm0, %v46_v37  ;;  %209 = vperm.xlu0 %1105, %v83_v38   ;;  %v61_v60 = vld [vmem:[%s1555_s2 + $0x8] sm:$0xff]  ;;  %v60_v0 = vld [vmem:[%s1555_s2] sm:$0xff]  ;;  %v628_v2 = vld [vmem:[%s1557_s4 + $0x30] sm:$0xff] }
  0x26   :  { %v77_v62 = vld [vmem:[%s1555_s2 + $0x88] sm:$0xff]  ;;  %v76_v1 = vld [vmem:[%s1555_s2 + $0x80] sm:$0xff]  ;;  %v629_v3 = vld [vmem:[%s1557_s4 + $0x38] sm:$0xff] }
  0x27   :  { %v626_v4 = vld [vmem:[%s1557_s4 + $0x20] sm:$0xff]  ;;  %v627_v5 = vld [vmem:[%s1557_s4 + $0x28] sm:$0xff]  ;;  %v624_v6 = vld [vmem:[%s1557_s4 + $0x10] sm:$0xff] }
  0x28   :  { %1062 = vmatmul.mubr.msk.f32.gmra.mxu0 %vm252_vm0, %v47_v39  ;;  %124 = vperm.xlu1 %1106, %v66_v40   ;;  %v625_v7 = vld [vmem:[%s1557_s4 + $0x18] sm:$0xff]  ;;  %v622_v8 = vld [vmem:[%s1557_s4] sm:$0xff]  ;;  %v623_v9 = vld [vmem:[%s1557_s4 + $0x8] sm:$0xff] }
  0x29   :  { %1064 = vmatprep.mubr.msk.f32.mxu0 %vm252_vm0, %v48_v41  ;;  %204 = vperm.xlu0 %1105, %v82_v42   ;;  %v786_v10 = vld [vmem:[%s1559_s6 + $0x8] sm:$0xff]  ;;  %v785_v11 = vld [vmem:[%s1559_s6] sm:$0xff] }
  0x2a   :  { %v607_v12 = vld [vmem:[%s1556_s3 + $0x8] sm:$0xff] }
  0x2b   :  { %734 = vmatprep.mubr.f32.mxu1 %v607_v12 }
  0x2c   :  { %1065 = vmatmul.mubr.msk.f32.gmra.mxu0 %vm252_vm0, %v49_v43  ;;  %119 = vperm.xlu1 %1106, %v65_v44  }
  0x2d   :  { %1067 = vmatprep.mubr.msk.f32.mxu0 %vm252_vm0, %v50_v45  ;;  %199 = vperm.xlu0 %1105, %v81_v46  }
  0x30   :  { %1068 = vmatmul.mubr.msk.f32.gmra.mxu0 %vm252_vm0, %v51_v47  ;;  %114 = vperm.xlu1 %1106, %v64_v48  }
  0x31   :  { %1070 = vmatprep.mubr.msk.f32.mxu0 %vm252_vm0, %v52_v49  ;;  %194 = vperm.xlu0 %1105, %v80_v50  }
  0x34   :  { %1071 = vmatmul.mubr.msk.f32.gmra.mxu0 %vm252_vm0, %v53_v51  ;;  %109 = vperm.xlu1 %1106, %v63_v52  }
  0x35   :  { %1073 = vmatprep.mubr.msk.f32.mxu0 %vm252_vm0, %v54_v53  ;;  %189 = vperm.xlu0 %1105, %v79_v54  }
  0x38   :  { %1074 = vmatmul.mubr.msk.f32.gmra.mxu0 %vm252_vm0, %v55_v55  ;;  %104 = vperm.xlu1 %1106, %v62_v56  }
  0x39   :  { %1076 = vmatprep.mubr.msk.f32.mxu0 %vm252_vm0, %v56_v57  ;;  %184 = vperm.xlu0 %1105, %v78_v58  }
  0x3c   :  { %1077 = vmatmul.mubr.msk.f32.gmra.mxu0 %vm252_vm0, %v57_v59  ;;  %99 = vperm.xlu1 %1106, %v61_v60  }
  0x3d   :  { %1079 = vmatprep.mubr.msk.f32.mxu0 %vm252_vm0, %v58_v61  ;;  %179 = vperm.xlu0 %1105, %v77_v62  }
  0x40   :  { %1080 = vmatmul.mubr.msk.f32.gmra.mxu0 %vm252_vm0, %v59_v63  ;;  %94 = vperm.xlu1 %1106, %v60_v0  }
  0x41   :  { %174 = vperm.xlu0 %1105, %v76_v1  }
  0x44   :  { %662 = vperm.xlu1 %1106, %v628_v2  }
  0x45   :  { %667 = vperm.xlu0 %1105, %v629_v3  }
  0x48   :  { %652 = vperm.xlu1 %1106, %v626_v4  }
  0x49   :  { %657 = vperm.xlu0 %1105, %v627_v5  }
  0x4c   :  { %642 = vperm.xlu1 %1106, %v624_v6  }
  0x4d   :  { %647 = vperm.xlu0 %1105, %v625_v7  }
  0x50   :  { %632 = vperm.xlu1 %1106, %v622_v8  }
  0x51   :  { %637 = vperm.xlu0 %1105, %v623_v9  }
  0x54   :  { %794 = vperm.xlu1 %1106, %v786_v10  }
  0x55   :  { %789 = vperm.xlu0 %1105, %v785_v11  }
  0x7f   :  { %v245_v13 = vpop.permute.xlu1 %244 }
  0x80   :  { %v250_v14 = vpop.permute.xlu0 %249 }
  0x83   :  { %v165_v17 = vpop.permute.xlu1 %164 }
  0x84   :  { %v170_v18 = vpop.permute.xlu0 %169 }
  0x87   :  { %v160_v22 = vpop.permute.xlu1 %159 }
  0x88   :  { %v240_v23 = vpop.permute.xlu0 %239 }
  0x8b   :  { %v155_v27 = vpop.permute.xlu1 %154 }
  0x8c   :  { %v235_v28 = vpop.permute.xlu0 %234 }
  0x8f   :  { %v150_v32 = vpop.permute.xlu1 %149 }
  0x90   :  { %v230_v33 = vpop.permute.xlu0 %229 }
  0x93   :  { %v145_v37 = vpop.permute.xlu1 %144 }
  0x94   :  { %v225_v38 = vpop.permute.xlu0 %224 }
  0x97   :  { %v140_v42 = vpop.permute.xlu1 %139 }
  0x98   :  { %v220_v43 = vpop.permute.xlu0 %219 }
  0x9b   :  { %v135_v47 = vpop.permute.xlu1 %134 }
  0x9c   :  { %v215_v48 = vpop.permute.xlu0 %214 }
  0x9f   :  { %v130_v52 = vpop.permute.xlu1 %129 }
  0xa0   :  { %v210_v53 = vpop.permute.xlu0 %209 }
  0xa3   :  { %v1471_v57 = vpop.permute.xlu1 %124 }
  0xa4   :  { %v205_v58 = vpop.permute.xlu0 %204 }
  0xa7   :  { %v1473_v62 = vpop.permute.xlu1 %119 }
  0xa8   :  { %v200_v63 = vpop.permute.xlu0 %199 }
  0xab   :  { %v1475_v6 = vpop.permute.xlu1 %114 }
  0xac   :  { %v195_v10 = vpop.permute.xlu0 %194 }
  0xc4   :  { %v1437_v15 = vpop.f32.mrf.mxu0 }
  0xc5   :  { %1561 = vst [vmem:[#allocation5_spill] sm:$0xff] %v1437_v15 }
  0xc6   :  { %v1439_v16 = vpop.f32.mrf.mxu0 }
  0xc7   :  { %1562 = vst [vmem:[#allocation6_spill] sm:$0xff] %v1439_v16 }
  0xc8   :  { %v1441_v19 = vpop.f32.mrf.mxu0 }
  0xca   :  { %v1443_v20 = vpop.f32.mrf.mxu0 }
  0xcb   :  { %1563 = vst [vmem:[#allocation7_spill] sm:$0xff] %v1443_v20 }
  0xcc   :  { %v1445_v21 = vpop.f32.mrf.mxu0 }
  0xce   :  { %v1447_v24 = vpop.f32.mrf.mxu0 }
  0xd0   :  { %v1449_v25 = vpop.f32.mrf.mxu0 }
  0xd2   :  { %v1451_v26 = vpop.f32.mrf.mxu0 }
  0xd4   :  { %v1453_v29 = vpop.f32.mrf.mxu0 }
  0xd6   :  { %v1455_v30 = vpop.f32.mrf.mxu0 }
  0xd8   :  { %v1051_v31 = vpop.f32.mrf.mxu0 }
  0xda   :  { %v465_v34 = vpop.f32.mrf.mxu0 }
  0xdc   :  { %v1054_v35 = vpop.f32.mrf.mxu0 }
  0xdd   :  { %v481_v11 = vadd.f32 %v1054_v35, %v160_v22 }
  0xde   :  { %v475_v36 = vpop.f32.mrf.mxu0 }
  0xdf   :  { %v476_v15 = vadd.f32 %v475_v36, %v155_v27  ;;  %v461_v27 = vadd.f32 %v1453_v29, %v140_v42  ;;  %v446_v42 = vadd.f32 %v1451_v26, %v1471_v57  ;;  %v436_v26 = vadd.f32 %v1447_v24, %v1475_v6 }
  0xe0   :  { %v1057_v39 = vpop.f32.mrf.mxu0 }
  0xe1   :  { %v491_v1 = vadd.f32 %v1057_v39, %v170_v18  ;;  %v110_v39 = vpop.permute.xlu1 %109  ;;  %v586_v22 = vmax.f32 %v476_v15, 0.0 }
  0xe2   :  { %v485_v40 = vpop.f32.mrf.mxu0  ;;  %v431_v57 = vadd.f32 %v1441_v19, %v110_v39  ;;  %v611_v39 = vld [vmem:[%s1556_s3 + $0x28] sm:$0xff] }
  0xe3   :  { %v486_v4 = vadd.f32 %v485_v40, %v165_v17  ;;  %v589_v12 = vmax.f32 %v491_v1, 0.0  ;;  %v587_v17 = vmax.f32 %v481_v11, 0.0 }
  0xe4   :  { %v1457_v41 = vpop.f32.mrf.mxu0 }
  0xe5   :  { %1564 = vst [vmem:[#allocation8_spill] sm:$0xff] %v1457_v41  ;;  %v588_v41 = vmax.f32 %v486_v4, 0.0 }
  0xe6   :  { %v1459_v44 = vpop.f32.mrf.mxu0 }
  0xe7   :  { %1565 = vst [vmem:[#allocation9_spill] sm:$0xff] %v1459_v44 }
  0xe8   :  { %v1461_v45 = vpop.f32.mrf.mxu0 }
  0xea   :  { %v1463_v46 = vpop.f32.mrf.mxu0 }
  0xec   :  { %v1465_v49 = vpop.f32.mrf.mxu0  ;;  %v1567_v24 = vld [vmem:[#allocation8_spill] sm:$0xff] }
  0xee   :  { %v1467_v50 = vpop.f32.mrf.mxu0  ;;  %v1569_v19 = vld [vmem:[#allocation9_spill] sm:$0xff] }
  0xf0   :  { %v1069_v51 = vpop.f32.mrf.mxu0 }
  0xf2   :  { %v1469_v54 = vpop.f32.mrf.mxu0 }
  0xf3   :  { %v526_v29 = vadd.f32 %v1469_v54, %v205_v58 }
  0xf4   :  { %v1072_v55 = vpop.f32.mrf.mxu0 }
  0xf6   :  { %v535_v56 = vpop.f32.mrf.mxu0 }
  0xf8   :  { %v1075_v59 = vpop.f32.mrf.mxu0 }
  0xf9   :  { %v551_v20 = vadd.f32 %v1075_v59, %v230_v33  ;;  %v536_v33 = vadd.f32 %v535_v56, %v215_v48  ;;  %v441_v48 = vadd.f32 %v1445_v21, %v1473_v62  ;;  %v578_v62 = vmax.f32 %v436_v26, 0.0 }
  0xfa   :  { %v545_v60 = vpop.f32.mrf.mxu0 }
  0xfb   :  { %v546_v40 = vadd.f32 %v545_v60, %v225_v38  ;;  %v601_v35 = vmax.f32 %v551_v20, 0.0  ;;  %v531_v38 = vadd.f32 %v1069_v51, %v210_v53  ;;  %v583_v20 = vmax.f32 %v461_v27, 0.0  ;;  %v619_v27 = vld [vmem:[%s1556_s3 + $0x68] sm:$0xff] }
  0xfc   :  { %v1078_v61 = vpop.f32.mrf.mxu0  ;;  %v596_v53 = vmax.f32 %v526_v29, 0.0  ;;  %v579_v21 = vmax.f32 %v441_v48, 0.0 }
  0xfd   :  { %v561_v7 = vadd.f32 %v1078_v61, %v240_v23  ;;  %v466_v61 = vadd.f32 %v465_v34, %v145_v37  ;;  %v451_v34 = vadd.f32 %v1449_v25, %v130_v52  ;;  %v598_v37 = vmax.f32 %v536_v33, 0.0  ;;  %v621_v33 = vld [vmem:[%s1556_s3 + $0x78] sm:$0xff] }
  0xfe   :  { %v555_v0 = vpop.f32.mrf.mxu0  ;;  %v516_v52 = vadd.f32 %v1467_v50, %v195_v10  ;;  %v1566_v50 = vld [vmem:[#allocation7_spill] sm:$0xff] }
  0xff   :  { %v556_v16 = vadd.f32 %v555_v0, %v235_v28  ;;  %v603_v18 = vmax.f32 %v561_v7, 0.0  ;;  %v541_v28 = vadd.f32 %v1072_v55, %v220_v43  ;;  %v581_v51 = vmax.f32 %v451_v34, 0.0 }
 0x100   :  { %v1081_v2 = vpop.f32.mrf.mxu0  ;;  %v580_v55 = vmax.f32 %v446_v42, 0.0  ;;  %v594_v59 = vmax.f32 %v516_v52, 0.0 }
 0x101   :  { %v571_v3 = vadd.f32 %v1081_v2, %v250_v14  ;;  %v471_v14 = vadd.f32 %v1051_v31, %v150_v32  ;;  %v602_v23 = vmax.f32 %v556_v16, 0.0  ;;  %v456_v31 = vadd.f32 %v1455_v30, %v135_v47  ;;  %v105_v16 = vpop.permute.xlu1 %104 }
 0x102   :  { %v565_v5 = vpop.f32.mrf.mxu0  ;;  %v584_v32 = vmax.f32 %v466_v61, 0.0  ;;  %v521_v30 = vadd.f32 %v1465_v49, %v200_v63  ;;  %v597_v47 = vmax.f32 %v531_v38, 0.0  ;;  %v426_v60 = vadd.f32 %v1566_v50, %v105_v16  ;;  %v615_v61 = vld [vmem:[%s1556_s3 + $0x48] sm:$0xff] }
 0x103   :  { %v566_v8 = vadd.f32 %v565_v5, %v245_v13  ;;  %v605_v9 = vmax.f32 %v571_v3, 0.0  ;;  %v190_v13 = vpop.permute.xlu0 %189  ;;  %v585_v36 = vmax.f32 %v471_v14, 0.0  ;;  %v582_v43 = vmax.f32 %v456_v31, 0.0  ;;  %v609_v14 = vld [vmem:[%s1556_s3 + $0x18] sm:$0xff]  ;;  %v783_v31 = vld [vmem:[%s1558_s5] sm:$0xff] }
 0x104   :  { %v511_v49 = vadd.f32 %v1461_v45, %v190_v13  ;;  %v595_v56 = vmax.f32 %v521_v30, 0.0  ;;  %v1568_v45 = vld [vmem:[#allocation5_spill] sm:$0xff]  ;;  %v577_v3 = vmax.f32 %v431_v57, 0.0 }
 0x105   :  { %v604_v44 = vmax.f32 %v566_v8, 0.0  ;;  %966 = vmatprep.subr.mxu1 %v605_v9  ;;  %v100_v25 = vpop.permute.xlu1 %99  ;;  %v576_v8 = vmax.f32 %v426_v60, 0.0  ;;  %v612_v13 = vld [vmem:[%s1556_s3 + $0x30] sm:$0xff] }
 0x106   :  { %967 = vmatpush3.msra.mxu1 %v589_v12  ;;  %v593_v1 = vmax.f32 %v511_v49, 0.0  ;;  %v421_v2 = vadd.f32 %v1568_v45, %v100_v25 }
 0x107   :  { %968 = vmatprep.subr.mxu1 %v604_v44  ;;  %v600_v44 = vmax.f32 %v546_v40, 0.0  ;;  %v185_v15 = vpop.permute.xlu0 %184  ;;  %v610_v40 = vld [vmem:[%s1556_s3 + $0x20] sm:$0xff] }
 0x108   :  { %969 = vmatpush3.msra.mxu1 %v588_v41  ;;  %v599_v41 = vmax.f32 %v541_v28, 0.0  ;;  %v506_v58 = vadd.f32 %v1463_v46, %v185_v15  ;;  %v1570_v46 = vld [vmem:[#allocation6_spill] sm:$0xff]  ;;  %v575_v10 = vmax.f32 %v421_v2, 0.0 }
 0x109   :  { %970 = vmatprep.subr.mxu1 %v603_v18  ;;  %v95_v63 = vpop.permute.xlu1 %94  ;;  %v606_v18 = vld [vmem:[%s1556_s3] sm:$0xff]  ;;  %v617_v28 = vld [vmem:[%s1556_s3 + $0x58] sm:$0xff] }
 0x10a   :  { %971 = vmatpush3.msra.mxu1 %v587_v17  ;;  %v592_v6 = vmax.f32 %v506_v58, 0.0  ;;  %v416_v7 = vadd.f32 %v1570_v46, %v95_v63  ;;  %v608_v17 = vld [vmem:[%s1556_s3 + $0x10] sm:$0xff] }
 0x10b   :  { %972 = vmatprep.subr.mxu1 %v602_v23  ;;  %v180_v54 = vpop.permute.xlu0 %179  ;;  %v613_v23 = vld [vmem:[%s1556_s3 + $0x38] sm:$0xff] }
 0x10c   :  { %973 = vmatpush3.msra.mxu1 %v586_v22  ;;  %v501_v0 = vadd.f32 %v1567_v24, %v180_v54  ;;  %v574_v12 = vmax.f32 %v416_v7, 0.0  ;;  %v614_v22 = vld [vmem:[%s1556_s3 + $0x40] sm:$0xff] }
 0x10d   :  { %974 = vmatprep.subr.mxu1 %v601_v35  ;;  %v616_v35 = vld [vmem:[%s1556_s3 + $0x50] sm:$0xff] }
 0x10e   :  { %975 = vmatpush3.msra.mxu1 %v585_v36  ;;  %v591_v9 = vmax.f32 %v501_v0, 0.0  ;;  %v618_v36 = vld [vmem:[%s1556_s3 + $0x60] sm:$0xff] }
 0x10f   :  { %976 = vmatprep.subr.mxu1 %v600_v44  ;;  %v175_v4 = vpop.permute.xlu0 %174  ;;  %v620_v44 = vld [vmem:[%s1556_s3 + $0x70] sm:$0xff] }
 0x110   :  { %977 = vmatpush3.msra.mxu1 %v584_v32  ;;  %v496_v5 = vadd.f32 %v1569_v19, %v175_v4 }
 0x111   :  { %978 = vmatprep.subr.mxu1 %v599_v41 }
 0x112   :  { %979 = vmatpush3.msra.mxu1 %v583_v20  ;;  %v590_v11 = vmax.f32 %v496_v5, 0.0 }
 0x113   :  { %980 = vmatprep.subr.mxu1 %v598_v37 }
 0x114   :  { %981 = vmatpush3.msra.mxu1 %v582_v43 }
 0x115   :  { %982 = vmatprep.subr.mxu1 %v597_v47  ;;  %v668_v47 = vpop.permute.xlu0 %667 }
 0x116   :  { %983 = vmatpush3.msra.mxu1 %v581_v51  ;;  %v663_v51 = vpop.permute.xlu1 %662 }
 0x117   :  { %984 = vmatprep.subr.mxu1 %v596_v53 }
 0x118   :  { %985 = vmatpush3.msra.mxu1 %v580_v55 }
 0x119   :  { %986 = vmatprep.subr.mxu1 %v595_v56  ;;  %v658_v54 = vpop.permute.xlu0 %657 }
 0x11a   :  { %987 = vmatpush3.msra.mxu1 %v579_v21  ;;  %v653_v56 = vpop.permute.xlu1 %652 }
 0x11b   :  { %988 = vmatprep.subr.mxu1 %v594_v59 }
 0x11c   :  { %989 = vmatpush3.msra.mxu1 %v578_v62 }
 0x11d   :  { %990 = vmatprep.subr.mxu1 %v593_v1  ;;  %v648_v62 = vpop.permute.xlu0 %647 }
 0x11e   :  { %991 = vmatpush3.msra.mxu1 %v577_v3  ;;  %v643_v1 = vpop.permute.xlu1 %642 }
 0x11f   :  { %992 = vmatprep.subr.mxu1 %v592_v6 }
 0x120   :  { %993 = vmatpush3.msra.mxu1 %v576_v8 }
 0x121   :  { %994 = vmatprep.subr.mxu1 %v591_v9  ;;  %v638_v6 = vpop.permute.xlu0 %637 }
 0x122   :  { %995 = vmatpush3.msra.mxu1 %v575_v10  ;;  %v633_v8 = vpop.permute.xlu1 %632 }
 0x123   :  { %996 = vmatprep.subr.mxu1 %v590_v11 }
 0x124   :  { %997 = vmatpush3.msra.mxu1 %v574_v12 }
 0x125   :  { %735 = vmatmul.mubr.f32.vlgmr.msra.gmra.mxu1 %v606_v18  ;;  %v784_v18 = vld [vmem:[%s1558_s5 + $0x8] sm:$0xff]  ;;  %s1111_s5 = scalar_lea.vmem %s889_s10, 256 }
 0x126   :  { %739 = vmatprep.mubr.f32.mxu1 %v609_v14  ;;  %v795_v14 = vpop.permute.xlu1 %794  ;;  %p1112_p0 = scmp.ne.s32.totalorder %s889_s10, %s1111_s5  ;;  %p1117_p2 = scmp.lt.s32.totalorder %s1111_s5, %s1111_s5 }
 0x128   :  { %p1118_p3 = por %p1117_p2, %p1116_p1 }
 0x129   :  { %740 = vmatmul.mubr.f32.gmra.mxu1 %v608_v17 }
 0x12a   :  { %744 = vmatprep.mubr.f32.mxu1 %v611_v39  ;;  %p1119_p4 = pnand %p1118_p3, %p1112_p0 }
 0x12d   :  { %745 = vmatmul.mubr.f32.gmra.mxu1 %v610_v40  ;;  %v790_v40 = vpop.permute.xlu0 %789 }
 0x12e   :  { %749 = vmatprep.mubr.f32.mxu1 %v613_v23 }
 0x131   :  { %750 = vmatmul.mubr.f32.gmra.mxu1 %v612_v13 }
 0x132   :  { %754 = vmatprep.mubr.f32.mxu1 %v615_v61 }
 0x135   :  { %755 = vmatmul.mubr.f32.gmra.mxu1 %v614_v22 }
 0x136   :  { %759 = vmatprep.mubr.f32.mxu1 %v617_v28 }
 0x139   :  { %760 = vmatmul.mubr.f32.gmra.mxu1 %v616_v35 }
 0x13a   :  { %764 = vmatprep.mubr.f32.mxu1 %v619_v27 }
 0x13d   :  { %765 = vmatmul.mubr.f32.gmra.mxu1 %v618_v36 }
 0x13e   :  { %769 = vmatprep.mubr.f32.mxu1 %v621_v33 }
 0x141   :  { %770 = vmatmul.mubr.f32.gmra.mxu1 %v620_v44 }
 0x142   :  { %1098 = vmatprep.mubr.msk.f32.mxu1 %vm797_vm1, %v783_v31 }
 0x1e5   :  { %v998_v32 = vpop.f32.mrf.mxu1 }
 0x1e7   :  { %v999_v16 = vpop.f32.mrf.mxu1 }
 0x1e8   :  { %v1000_v4 = vadd.f32 %v999_v16, %v998_v32 }
 0x1e9   :  { %v1001_v38 = vpop.f32.mrf.mxu1 }
 0x1ea   :  { %v737_v9 = vadd.f32 %v1000_v4, %v633_v8 }
 0x1eb   :  { %v1002_v41 = vpop.f32.mrf.mxu1 }
 0x1ec   :  { %v1003_v45 = vadd.f32 %v1002_v41, %v1001_v38  ;;  %v775_v12 = vmax.f32 %v737_v9, 0.0 }
 0x1ed   :  { %v1004_v15 = vpop.f32.mrf.mxu1 }
 0x1ee   :  { %v742_v46 = vadd.f32 %v1003_v45, %v638_v6 }
 0x1ef   :  { %v1005_v34 = vpop.f32.mrf.mxu1 }
 0x1f0   :  { %v1006_v63 = vadd.f32 %v1005_v34, %v1004_v15  ;;  %v776_v11 = vmax.f32 %v742_v46, 0.0 }
 0x1f1   :  { %v1007_v20 = vpop.f32.mrf.mxu1 }
 0x1f2   :  { %v747_v19 = vadd.f32 %v1006_v63, %v643_v1 }
 0x1f3   :  { %v1008_v29 = vpop.f32.mrf.mxu1 }
 0x1f4   :  { %v1009_v59 = vadd.f32 %v1008_v29, %v1007_v20  ;;  %v777_v10 = vmax.f32 %v747_v19, 0.0 }
 0x1f5   :  { %v1010_v37 = vpop.f32.mrf.mxu1 }
 0x1f6   :  { %v752_v2 = vadd.f32 %v1009_v59, %v648_v62 }
 0x1f7   :  { %v1011_v42 = vpop.f32.mrf.mxu1 }
 0x1f8   :  { %v1012_v57 = vadd.f32 %v1011_v42, %v1010_v37  ;;  %v778_v7 = vmax.f32 %v752_v2, 0.0 }
 0x1f9   :  { %v1013_v43 = vpop.f32.mrf.mxu1 }
 0x1fa   :  { %v757_v24 = vadd.f32 %v1012_v57, %v653_v56 }
 0x1fb   :  { %v1014_v30 = vpop.f32.mrf.mxu1 }
 0x1fc   :  { %v1015_v55 = vadd.f32 %v1014_v30, %v1013_v43  ;;  %v779_v5 = vmax.f32 %v757_v24, 0.0 }
 0x1fd   :  { %v1016_v48 = vpop.f32.mrf.mxu1 }
 0x1fe   :  { %v762_v50 = vadd.f32 %v1015_v55, %v658_v54 }
 0x1ff   :  { %v1017_v25 = vpop.f32.mrf.mxu1 }
 0x200   :  { %v1018_v53 = vadd.f32 %v1017_v25, %v1016_v48  ;;  %v780_v3 = vmax.f32 %v762_v50, 0.0 }
 0x201   :  { %v1019_v52 = vpop.f32.mrf.mxu1 }
 0x202   :  { %v767_v21 = vadd.f32 %v1018_v53, %v663_v51 }
 0x203   :  { %v1020_v26 = vpop.f32.mrf.mxu1 }
 0x204   :  { %v1021_v49 = vadd.f32 %v1020_v26, %v1019_v52  ;;  %v781_v0 = vmax.f32 %v767_v21, 0.0 }
 0x206   :  { %v772_v58 = vadd.f32 %v1021_v49, %v668_v47 }
 0x208   :  { %v782_v60 = vmax.f32 %v772_v58, 0.0 }
 0x20a   :  { %1082 = vmatprep.subr.mxu1 %v782_v60 }
 0x20b   :  { %1083 = vmatpush3.msra.mxu1 %v782_v60 }
 0x20c   :  { %1084 = vmatprep.subr.mxu1 %v781_v0 }
 0x20d   :  { %1085 = vmatpush3.msra.mxu1 %v781_v0 }
 0x20e   :  { %1086 = vmatprep.subr.mxu1 %v780_v3 }
 0x20f   :  { %1087 = vmatpush3.msra.mxu1 %v780_v3 }
 0x210   :  { %1088 = vmatprep.subr.mxu1 %v779_v5 }
 0x211   :  { %1089 = vmatpush3.msra.mxu1 %v779_v5 }
 0x212   :  { %1090 = vmatprep.subr.mxu1 %v778_v7 }
 0x213   :  { %1091 = vmatpush3.msra.mxu1 %v778_v7 }
 0x214   :  { %1092 = vmatprep.subr.mxu1 %v777_v10 }
 0x215   :  { %1093 = vmatpush3.msra.mxu1 %v777_v10 }
 0x216   :  { %1094 = vmatprep.subr.mxu1 %v776_v11 }
 0x217   :  { %1095 = vmatpush3.msra.mxu1 %v776_v11 }
 0x218   :  { %1096 = vmatprep.subr.mxu1 %v775_v12 }
 0x219   :  { %1097 = vmatpush3.msra.mxu1 %v775_v12 }
 0x21a   :  { %1099 = vmatmul.mubr.msk.f32.vlgmr.msra.gmra.mxu1 %vm797_vm1, %v784_v18 }
 0x2da   :  { %v1100_v17 = vpop.f32.mrf.mxu1 }
 0x2db   :  { %v876_v39 = vadd.f32 %v1100_v17, %v795_v14 }
 0x2dc   :  { %v870_v23 = vpop.f32.mrf.mxu1 }
 0x2dd   :  { %1107 = vtanh.f32 %v876_v39  ;;  %v871_v13 = vadd.f32 %v870_v23, %v790_v40 }
 0x2df   :  { %1109 = vtanh.f32 %v871_v13 }
 0x2ea   :  { %v1108_v61 = vpop.eup %1107 }
 0x2eb   :  { %882 = vst [vmem:[#allocation2 + $0x8] sm:$0xff] %v1108_v61 }
 0x2ec   :  { %v1110_v22 = vpop.eup %1109 }
 0x2ed   :  { %881 = vst [vmem:[#allocation2] sm:$0xff] %v1110_v22 }
 0x2ee   :  { %1122 = shalt.err (!%p1119_p4)
}
 0x2ef   :  { %s1135_s11 = smov 128   ;;  %s1136_s12 = smov 8  }
 0x2f0   :  { %894 = dma.vmem_to_hbm [thread:$0]  %s889_s10, 256, %s1560_s7, [#allocation3], %s1135_s11, %s1135_s11, %s1136_s12  }
 0x2f1   :  { %1131 = dma.done.wait [#allocation3], 256  }
 0x2f2   :  { %1132 = vsyncadd [#allocation3], 4294967040 }
 0x2f3   :  { %898 = vsyncpa [#allocation3], 1 }

</bundles_post_ra>
